<compile_context>
chip_gen: v6e
topology: v6e:2x2x1
jax: 0.10.0
libtpu: 0.0.40
codegen_flags: <defaults>
</compile_context>

<pallas_src>
import jax
import jax.numpy as jnp
from jax.experimental import pallas as pl
from jax.experimental.pallas import tpu as pltpu


def _round_up(n, m):
    return ((n + m - 1) // m) * m


# ----------------------------------------------------------------------------
# Kernel
# ----------------------------------------------------------------------------
def dqn_kernel(x_ref, w1_ref, b1_ref, w2_ref, b2_ref, w3_ref, b3_ref, o_ref):
    """Fused 3-layer MLP.  x cast to bf16 in-kernel; dots accumulate f32;
    bias-add + ReLU stay f32 (VPU)."""
    x = x_ref[...].astype(jnp.bfloat16)
    # Layer 1: Linear + ReLU
    h1 = jnp.dot(x, w1_ref[...], preferred_element_type=jnp.float32)
    h1 = jnp.maximum(h1 + b1_ref[...], 0.0)
    # Layer 2: Linear + ReLU
    h2 = jnp.dot(h1.astype(jnp.bfloat16), w2_ref[...],
                 preferred_element_type=jnp.float32)
    h2 = jnp.maximum(h2 + b2_ref[...], 0.0)
    # Layer 3: Linear (Q-values, no activation) — stored at true n_out width.
    q = jnp.dot(h2.astype(jnp.bfloat16), w3_ref[...],
                preferred_element_type=jnp.float32)
    o_ref[...] = (q + b3_ref[...]).astype(o_ref.dtype)
    # TODO(synk): if the consumer is action selection / TD targets, fuse the
    # argmax / Q(s,a) gather here to drop the Q-value writeback entirely.


# ----------------------------------------------------------------------------
# Parameter preparation (bf16 weight cast) — hoist out of the hot loop.
# ----------------------------------------------------------------------------
def prepare_dqn_params(params):
    return {
        "w1": params["w1"].astype(jnp.bfloat16),
        "b1": params["b1"].astype(jnp.float32).reshape(1, -1),
        "w2": params["w2"].astype(jnp.bfloat16),
        "b2": params["b2"].astype(jnp.float32).reshape(1, -1),
        "w3": params["w3"].astype(jnp.bfloat16),
        "b3": params["b3"].astype(jnp.float32).reshape(1, -1),
    }


# ----------------------------------------------------------------------------
# Forward
# ----------------------------------------------------------------------------
def dqn_forward(x, prepped, *, block_b=1024):
    """x: [B, input_size] (f32).  prepped: output of prepare_dqn_params."""
    w1, b1 = prepped["w1"], prepped["b1"]
    w2, b2 = prepped["w2"], prepped["b2"]
    w3, b3 = prepped["w3"], prepped["b3"]
    B, n_in = x.shape
    h0, h1n, n_out = w1.shape[1], w2.shape[1], w3.shape[1]

    flops = 2 * B * (n_in * h0 + h0 * h1n + h1n * n_out)
    bytes_accessed = (
        B * n_in * x.dtype.itemsize + B * n_out * 4
        + sum(int(a.size) * a.dtype.itemsize for a in (w1, b1, w2, b2, w3, b3)))
    cost = pl.CostEstimate(flops=flops, transcendentals=0,
                           bytes_accessed=bytes_accessed)
    out_shape = jax.ShapeDtypeStruct((B, n_out), jnp.float32)

    if B <= block_b:
        # Tiny / latency path: no grid machinery, everything whole-array in VMEM.
        vmem = pl.BlockSpec(memory_space=pltpu.MemorySpace.VMEM)
        out = pl.pallas_call(
            dqn_kernel,
            out_shape=out_shape,
            in_specs=[vmem] * 7,
            out_specs=vmem,
            cost_estimate=cost,
        )(x, w1, b1, w2, b2, w3, b3)
    else:
        # Training-batch path: tile the batch (weights VMEM-resident via
        # constant index_maps, x/out tiles double-buffered).  Grid length is
        # always >= 2 here (B > block_b) so v7x's two TCs both get work; the
        # ragged last block is handled by Pallas masking (no explicit x pad).
        num_steps = pl.cdiv(B, block_b)
        tb = _round_up(pl.cdiv(B, num_steps), 256)   # multiple of 256 (MXU M)
        const2 = lambda i: (0, 0)
        out = pl.pallas_call(
            dqn_kernel,
            out_shape=out_shape,
            grid=(pl.cdiv(B, tb),),
            in_specs=[
                pl.BlockSpec((tb, n_in), lambda i: (i, 0)),
                pl.BlockSpec(w1.shape, const2), pl.BlockSpec(b1.shape, const2),
                pl.BlockSpec(w2.shape, const2), pl.BlockSpec(b2.shape, const2),
                pl.BlockSpec(w3.shape, const2), pl.BlockSpec(b3.shape, const2),
            ],
            out_specs=pl.BlockSpec((tb, n_out), lambda i: (i, 0)),
            compiler_params=pltpu.CompilerParams(
                dimension_semantics=("parallel",)),
            cost_estimate=cost,
        )(x, w1, b1, w2, b2, w3, b3)

    return out.astype(x.dtype)


# ----------------------------------------------------------------------------
# Init (matches the PyTorch module) + pure-JAX reference
# ----------------------------------------------------------------------------
def xavier_uniform(key, fan_in, fan_out, dtype=jnp.float32):
    # Matches torch.nn.init.xavier_uniform_ (gain=1.0); symmetric distribution
    # so sampling directly in [in, out] (transposed storage) is equivalent.
    bound = (6.0 / (fan_in + fan_out)) ** 0.5
    return jax.random.uniform(key, (fan_in, fan_out), dtype, -bound, bound)


def init_dqn_params(key, input_size, hidden_size, output_size):
    k1, k2, k3 = jax.random.split(key, 3)
    h0, h1 = hidden_size
    return {
        "w1": xavier_uniform(k1, input_size, h0),
        "b1": jnp.full((1, h0), 0.01, jnp.float32),
        "w2": xavier_uniform(k2, h0, h1),
        "b2": jnp.full((1, h1), 0.01, jnp.float32),
        "w3": xavier_uniform(k3, h1, output_size),
        "b3": jnp.full((1, output_size), 0.01, jnp.float32),
    }


def dqn_reference(x, p):
    h1 = jnp.maximum(x @ p["w1"] + p["b1"], 0.0)
    h2 = jnp.maximum(h1 @ p["w2"] + p["b2"], 0.0)
    return h2 @ p["w3"] + p["b3"]


# ----------------------------------------------------------------------------
if __name__ == "__main__":
    key = jax.random.PRNGKey(0)
    k_param, k_x_small, k_x_big = jax.random.split(key, 3)

    # Small shapes consistent with the module's dqn_param.
    batch = 8
    input_size = 16
    hidden_size = (32, 32)
    output_size = 8

    params = init_dqn_params(k_param, input_size, hidden_size, output_size)
    prepped = prepare_dqn_params(params)

    # 1) Tiny latency path (gridless, whole-in-VMEM).
    x_small = jax.random.normal(k_x_small, (batch, input_size), jnp.float32)
    out_small = jax.block_until_ready(dqn_forward(x_small, prepped))
    ref_small = dqn_reference(x_small, params)
    assert out_small.shape == (batch, output_size)
    assert jnp.allclose(out_small, ref_small, atol=5e-2, rtol=5e-2), (
        float(jnp.max(jnp.abs(out_small - ref_small))))

    # 2) Training-batch path (batch-tiled grid; deliberately non-divisible B
    #    to exercise the masked ragged last block — no explicit pad copy).
    big_batch = 300
    x_big = jax.random.normal(k_x_big, (big_batch, input_size), jnp.float32)
    out_big = jax.block_until_ready(dqn_forward(x_big, prepped, block_b=256))
    ref_big = dqn_reference(x_big, params)
    assert out_big.shape == (big_batch, output_size)
    assert jnp.allclose(out_big, ref_big, atol=5e-2, rtol=5e-2), (
        float(jnp.max(jnp.abs(out_big - ref_big))))

    print("KERNEL_OK")
</pallas_src>

<mosaic_0001>
module attributes {stable_mosaic.version = 11 : i64} {
  func.func @dqn_kernel(%arg0: memref<8x16xf32, #tpu.memory_space<vmem>>, %arg1: memref<16x32xbf16, #tpu.memory_space<vmem>>, %arg2: memref<1x32xf32, #tpu.memory_space<vmem>>, %arg3: memref<32x32xbf16, #tpu.memory_space<vmem>>, %arg4: memref<1x32xf32, #tpu.memory_space<vmem>>, %arg5: memref<32x8xbf16, #tpu.memory_space<vmem>>, %arg6: memref<1x8xf32, #tpu.memory_space<vmem>>, %arg7: memref<8x8xf32, #tpu.memory_space<vmem>>) attributes {dimension_semantics = [], scalar_prefetch = 0 : i64, scratch_operands = 0 : i64, tpu.core_type = #tpu.core_type<tc>} {
    %c0 = arith.constant 0 : index
    %c0_0 = arith.constant 0 : index
    %0 = vector.load %arg0[%c0, %c0_0] : memref<8x16xf32, #tpu.memory_space<vmem>>, vector<8x16xf32>
    %1 = arith.truncf %0 : vector<8x16xf32> to vector<8x16xbf16>
    %c0_1 = arith.constant 0 : index
    %c0_2 = arith.constant 0 : index
    %2 = vector.load %arg1[%c0_1, %c0_2] : memref<16x32xbf16, #tpu.memory_space<vmem>>, vector<16x32xbf16>
    %cst = arith.constant dense<0.000000e+00> : vector<8x32xf32>
    %3 = tpu.matmul %1, %2, %cst {dimension_numbers = #tpu.dot_dimension_numbers<[1], [0], [0], [1], [0, 0, 1, 1], [], []>} : vector<8x16xbf16>, vector<16x32xbf16>, vector<8x32xf32> -> vector<8x32xf32>
    %c0_3 = arith.constant 0 : index
    %c0_4 = arith.constant 0 : index
    %4 = vector.load %arg2[%c0_3, %c0_4] : memref<1x32xf32, #tpu.memory_space<vmem>>, vector<1x32xf32>
    %5 = vector.broadcast %4 : vector<1x32xf32> to vector<8x32xf32>
    %6 = arith.addf %3, %5 : vector<8x32xf32>
    %cst_5 = arith.constant 0.000000e+00 : f32
    %7 = vector.broadcast %cst_5 : f32 to vector<8x32xf32>
    %8 = arith.maximumf %6, %7 : vector<8x32xf32>
    %9 = arith.truncf %8 : vector<8x32xf32> to vector<8x32xbf16>
    %c0_6 = arith.constant 0 : index
    %c0_7 = arith.constant 0 : index
    %10 = vector.load %arg3[%c0_6, %c0_7] : memref<32x32xbf16, #tpu.memory_space<vmem>>, vector<32x32xbf16>
    %cst_8 = arith.constant dense<0.000000e+00> : vector<8x32xf32>
    %11 = tpu.matmul %9, %10, %cst_8 {dimension_numbers = #tpu.dot_dimension_numbers<[1], [0], [0], [1], [0, 0, 1, 1], [], []>} : vector<8x32xbf16>, vector<32x32xbf16>, vector<8x32xf32> -> vector<8x32xf32>
    %c0_9 = arith.constant 0 : index
    %c0_10 = arith.constant 0 : index
    %12 = vector.load %arg4[%c0_9, %c0_10] : memref<1x32xf32, #tpu.memory_space<vmem>>, vector<1x32xf32>
    %13 = vector.broadcast %12 : vector<1x32xf32> to vector<8x32xf32>
    %14 = arith.addf %11, %13 : vector<8x32xf32>
    %cst_11 = arith.constant 0.000000e+00 : f32
    %15 = vector.broadcast %cst_11 : f32 to vector<8x32xf32>
    %16 = arith.maximumf %14, %15 : vector<8x32xf32>
    %17 = arith.truncf %16 : vector<8x32xf32> to vector<8x32xbf16>
    %c0_12 = arith.constant 0 : index
    %c0_13 = arith.constant 0 : index
    %18 = vector.load %arg5[%c0_12, %c0_13] : memref<32x8xbf16, #tpu.memory_space<vmem>>, vector<32x8xbf16>
    %cst_14 = arith.constant dense<0.000000e+00> : vector<8x8xf32>
    %19 = tpu.matmul %17, %18, %cst_14 {dimension_numbers = #tpu.dot_dimension_numbers<[1], [0], [0], [1], [0, 0, 1, 1], [], []>} : vector<8x32xbf16>, vector<32x8xbf16>, vector<8x8xf32> -> vector<8x8xf32>
    %c0_15 = arith.constant 0 : index
    %c0_16 = arith.constant 0 : index
    %20 = vector.load %arg6[%c0_15, %c0_16] : memref<1x8xf32, #tpu.memory_space<vmem>>, vector<1x8xf32>
    %21 = vector.broadcast %20 : vector<1x8xf32> to vector<8x8xf32>
    %22 = arith.addf %19, %21 : vector<8x8xf32>
    %c0_17 = arith.constant 0 : index
    %c0_18 = arith.constant 0 : index
    %23 = vector.load %arg7[%c0_17, %c0_18] : memref<8x8xf32, #tpu.memory_space<vmem>>, vector<8x8xf32>
    tpu.vector_store %arg7[%c0_17, %c0_18], %22 {strides = array<i32>} : memref<8x8xf32, #tpu.memory_space<vmem>>, vector<8x8xf32>,
    return
  }
}

</mosaic_0001>

<bundles_post_ra>
// kernel: tpu_custom_call.1
= control target key start
LH: loop header
LB: loop body
LE: loop exit
PB: predicated region body
PF: predicated region fallthrough
CT: control target
= control target key end

     0   :  { %12 = vsyncpa [#allocation3], 0  ;;  %s466_s0 = inlined_call_operand.vmem [shape: f32[8,16], index: 0, kind: input, shape index: {}]   ;;  %s467_s1 = inlined_call_operand.hbm [shape: bf16[16,32], index: 1, kind: input, shape index: {}]   ;;  %s468_s2 = inlined_call_operand.vmem [shape: f32[1,32], index: 2, kind: input, shape index: {}]   ;;  %s469_s3 = inlined_call_operand.vmem [shape: bf16[32,32], index: 3, kind: input, shape index: {}]   ;;  %s470_s4 = inlined_call_operand.hbm [shape: f32[1,32], index: 4, kind: input, shape index: {}]   ;;  %s471_s5 = inlined_call_operand.vmem [shape: bf16[32,8], index: 5, kind: input, shape index: {}]   ;;  %s472_s6 = inlined_call_operand.vmem [shape: f32[1,8], index: 6, kind: input, shape index: {}]   ;;  %s473_s7 = inlined_call_operand.hbm [shape: f32[8,8], index: 7, kind: output, shape index: {}]  }
   0x1   :  { %13 = vsyncpa [#allocation6], 0 }
   0x2   :  { %14 = vsyncpa [#allocation4], 0  ;;  %s389_s24 = smov [#allocation2]  }
   0x3   :  { %s22_s25 = sshll.u32 %s389_s24, 4  ;;  %s23_s25 = int_to_ptr.vmem [resolvable:$true] %s22_s25 }
   0x4   :  { %s331_s26 = scalar_lea.vmem %s23_s25, 128  ;;  %p336_p1 = scmp.lt.s32.totalorder %s23_s25, %s23_s25 }
   0x5   :  { %p332_p0 = scmp.ne.s32.totalorder %s23_s25, %s331_s26  ;;  %p337_p2 = scmp.lt.s32.totalorder %s331_s26, %s331_s26 }
   0x7   :  { %p338_p3 = por %p337_p2, %p336_p1 }
   0x9   :  { %p339_p4 = pnand %p338_p3, %p332_p0 }
   0xb   :  { %342 = shalt.err (!%p339_p4)
}
   0xc   :  { %s390_s27 = smov 64   ;;  %s391_s28 = smov 4  }
   0xd   :  { %28 = dma.hbm_to_vmem [thread:$0]  %s467_s1, 128, %s23_s25, [#allocation3], %s390_s27, %s390_s27, %s391_s28  }
   0xe   :  { %s392_s8 = smov [#allocation5]  }
   0xf   :  { %s39_s9 = sshll.u32 %s392_s8, 4  ;;  %s40_s9 = int_to_ptr.vmem [resolvable:$true] %s39_s9 }
  0x10   :  { %s351_s10 = scalar_lea.vmem %s40_s9, 16  ;;  %s355_s11 = scalar_lea.vmem %s40_s9, 32 }
  0x11   :  { %p352_p5 = scmp.ne.s32.totalorder %s40_s9, %s351_s10  ;;  %p356_p6 = scmp.lt.s32.totalorder %s40_s9, %s40_s9 }
  0x12   :  { %p357_p7 = scmp.lt.s32.totalorder %s355_s11, %s351_s10 }
  0x14   :  { %p358_p8 = por %p357_p7, %p356_p6 }
  0x16   :  { %p359_p9 = pnand %p358_p8, %p352_p5 }
  0x18   :  { %362 = shalt.err (!%p359_p9)
}
  0x19   :  { %42 = dma.hbm_to_vmem [thread:$0]  %s470_s4, 16, %s40_s9, [#allocation6]  }
  0x1a   :  { %383 = dma.done.wait [#allocation3], 128  }
  0x1b   :  { %384 = vsyncadd [#allocation3], 4294967168 }
  0x1c   :  { %385 = dma.done.wait [#allocation6], 16  }
  0x1d   :  { %386 = vsyncadd [#allocation6], 4294967280  ;;  %v393_v0 = vmov 0.0   ;;  %vm394_vm0 = vmmov 0   ;;  %v318_v1 = vld [vmem:[#allocation2] sm:$0xff]   ;;  %vm71_vm1 = vcmask 130048  }
  0x1e   :  { %289 = vmatprep.subr.bf16.mxu0 %v393_v0  ;;  %291 = vmatprep.mubr.msk.bf16.mxu0 %vm394_vm0, %v393_v0  ;;  %v54_v2 = vld [vmem:[%s466_s0] sm:$0xff]  ;;  %v319_v4 = vld [vmem:[%s469_s3 + $0x8] sm:$0xff]   ;;  %vm140_vm2 = vcmask 261120   ;;  %s395_s23 = smov [#allocation7]   ;;  %vm252_vm3 = vcmask 64512  }
  0x1f   :  { %295 = vmatprep.subr.bf16.mxu1 %v393_v0  ;;  %299 = vmatprep.mubr.msk.bf16.mxu1 %vm394_vm0, %v393_v0  ;;  %v55_v3 = vpack.c.bf16 %v54_v2, %v54_v2  ;;  %v320_v5 = vld [vmem:[%s469_s3] sm:$0xff]   ;;  %v321_v6 = vld [vmem:[%s471_s5 + $0x8] sm:$0xff]   ;;  %s260_s24 = sshll.u32 %s395_s23, 4  ;;  %s261_s24 = int_to_ptr.vmem [resolvable:$true] %s260_s24 }
  0x20   :  { %290 = vmatpush3.bf16.msra.mxu0 %v318_v1  ;;  %296 = vmatpush3.bf16.msra.mxu1 %v319_v4  ;;  %v270_v7 = vld [vmem:[%s468_s2] ss:$0 sm:$0xff]  ;;  %v273_v16 = vld [vmem:[#allocation5] ss:$0 sm:$0xff]  ;;  %p368_p11 = scmp.lt.s32.totalorder %s261_s24, %s261_s24 }
  0x21   :  { %303 = vmatprep.subr.bf16.mxu0 %v393_v0  ;;  %297 = vmatprep.subr.bf16.mxu1 %v393_v0  ;;  %v322_v15 = vld [vmem:[%s471_s5] sm:$0xff]   ;;  %s363_s5 = scalar_lea.vmem %s261_s24, 128 }
  0x22   :  { %v277_v24 = vld [vmem:[%s472_s6] ss:$0 sm:$0xff]  ;;  %p364_p10 = scmp.ne.s32.totalorder %s261_s24, %s363_s5  ;;  %p369_p12 = scmp.lt.s32.totalorder %s363_s5, %s363_s5 }
  0x23   :  { %292 = vmatmul.mubr.msk.bf16.vlgmr.msra.gmra.mxu0 %vm71_vm1, %v55_v3 }
  0x24   :  { %307 = vmatprep.mubr.msk.bf16.mxu0 %vm394_vm0, %v393_v0  ;;  %298 = vmatpush3.bf16.msra.mxu1 %v320_v5  ;;  %p370_p13 = por %p369_p12, %p368_p11 }
  0x25   :  { %304 = vmatpush3.bf16.msra.mxu0 %v321_v6 }
  0x26   :  { %305 = vmatprep.subr.bf16.mxu0 %v393_v0  ;;  %p371_p0 = pnand %p370_p13, %p364_p10 }
  0x29   :  { %306 = vmatpush3.bf16.msra.mxu0 %v322_v15 }
  0xe3   :  { %v109_v8 = vpop.f32.mrf.mxu0 }
  0xe4   :  { %v110_v9 = vadd.f32 %v270_v7, %v109_v8 }
  0xe5   :  { %v293_v10 = vpop.f32.mrf.mxu0 }
  0xe6   :  { %v115_v11 = vmax.f32 %v110_v9, 0.0 }
  0xe7   :  { %v112_v12 = vpop.f32.mrf.mxu0 }
  0xe8   :  { %v116_v13 = vpack.c.bf16 %v115_v11, %v115_v11 }
  0xe9   :  { %v294_v14 = vpop.f32.mrf.mxu0 }
  0xea   :  { %300 = vmatmul.mubr.msk.bf16.vlgmr.msra.gmra.mxu1 %vm140_vm2, %v116_v13 }
 0x1aa   :  { %v178_v17 = vpop.f32.mrf.mxu1 }
 0x1ab   :  { %v179_v18 = vadd.f32 %v273_v16, %v178_v17 }
 0x1ac   :  { %v301_v19 = vpop.f32.mrf.mxu1 }
 0x1ad   :  { %v184_v20 = vmax.f32 %v179_v18, 0.0 }
 0x1ae   :  { %v181_v21 = vpop.f32.mrf.mxu1 }
 0x1af   :  { %v185_v22 = vpack.c.bf16 %v184_v20, %v184_v20 }
 0x1b0   :  { %v302_v23 = vpop.f32.mrf.mxu1 }
 0x1b1   :  { %308 = vmatmul.mubr.msk.bf16.vlgmr.msra.gmra.mxu0 %vm140_vm2, %v185_v22 }
 0x271   :  { %v246_v25 = vpop.f32.mrf.mxu0 }
 0x272   :  { %v247_v26 = vadd.f32 %v277_v24, %v246_v25 }
 0x273   :  { %v309_v27 = vpop.f32.mrf.mxu0 }
 0x274   :  { %253 = vst.msk [vmem:[#allocation7] sm:$0xff] %vm252_vm3, %v247_v26 }
 0x275   :  { %v249_v28 = vpop.f32.mrf.mxu0 }
 0x276   :  { %374 = shalt.err (!%p371_p0)
}
 0x277   :  { %263 = dma.vmem_to_hbm [thread:$0]  %s261_s24, 128, %s473_s7, [#allocation4]   ;;  %v310_v29 = vpop.f32.mrf.mxu0 }
 0x278   :  { %387 = dma.done.wait [#allocation4], 128  }
 0x279   :  { %388 = vsyncadd [#allocation4], 4294967168 }
 0x27a   :  { %267 = vsyncpa [#allocation3], 1 }
 0x27b   :  { %268 = vsyncpa [#allocation6], 1 }
 0x27c   :  { %269 = vsyncpa [#allocation4], 1 }

</bundles_post_ra>
